<compile_context>
chip_gen: v6e
topology: v6e:2x2x1
jax: 0.10.0
libtpu: 0.0.40
codegen_flags: <defaults>
</compile_context>

<pallas_src>
import jax
import jax.numpy as jnp
from jax.experimental import pallas as pl
from jax.experimental.pallas import tpu as pltpu


def _make_gat_gate_kernel(binary_adj):
    """Build the kernel body.  `binary_adj` is a static Python flag:
       True  -> adj arrives as int8 {0,1}; `attention * adj` == zeroing masked entries.
       False -> adj arrives as bf16 edge weights; the multiply is kept (original semantics).
    """

    def kernel(x_ref, adj_ref, wt_ref, bw_ref, asym_ref,
               gwx_ref, gwh_ref, gb_ref, out_ref):
        bt, N, D = x_ref.shape

        x = x_ref[...]                                    # (bt, N, D) f32
        adj = adj_ref[...]                                # (bt, N, N) int8 or bf16
        # Single mask compute; int8 is widened to i32 for lowering portability.
        if binary_adj:
            mask = adj.astype(jnp.int32) > 0
        else:
            mask = adj > 0

        Wt = wt_ref[...]                                  # (D, D) bf16 (= torch W.weight.T)
        A_sym = asym_ref[...]                             # (D, D) bf16 (= A + A^T)
        bw = bw_ref[...]                                  # (1, D) f32

        # --- h = x @ W^T + b: fold (bt*N) rows into one MXU lhs, bf16 operands, f32 acc.
        x2 = x.reshape(bt * N, D).astype(jnp.bfloat16)
        h2 = jnp.dot(x2, Wt, preferred_element_type=jnp.float32) + bw    # (bt*N, D) f32
        h2_b = h2.astype(jnp.bfloat16)                    # single f32->bf16 pass, reused
        h_b = h2_b.reshape(bt, N, D)                      # (bt, N, D) bf16

        # --- e = (h @ (A + A^T)) @ h^T  (symmetrisation folded into A_sym)
        hA = jnp.dot(h2_b, A_sym, preferred_element_type=jnp.float32)    # (bt*N, D) f32
        hA_b = hA.astype(jnp.bfloat16).reshape(bt, N, D)
        e = jnp.einsum('bnd,bmd->bnm', hA_b, h_b,
                       preferred_element_type=jnp.float32)               # (bt, N, N) f32

        # --- masked softmax over dim=1 (columns), minimal N^2 VPU passes.
        att = jnp.where(mask, e, -9.0e15)                 # single where, scalar fill
        m = jnp.max(att, axis=1, keepdims=True)           # (bt, 1, N)
        p = jnp.exp(att - m)                              # (bt, N, N) f32
        # Unmasked denom keeps PyTorch's uniform-softmax fallback on fully-masked
        # columns (zeroed just below) and is always >= 1 -> no Inf/NaN from recip.
        denom = jnp.sum(p, axis=1, keepdims=True)         # (bt, 1, N)

        # `attention * adj`: fold zeroing / edge-weighting into the bf16 cast of p.
        if binary_adj:
            p_b = jnp.where(mask, p, 0.0).astype(jnp.bfloat16)
        else:
            p_b = (p * adj).astype(jnp.bfloat16)

        # Fold the 1/denom column normalisation into the h rows used by att @ h
        # (N*D work instead of N^2): h'[i] = sum_m p[i,m] * (h[m] / denom[m]).
        inv = pl.reciprocal(denom, approx=True)           # (bt, 1, N), EUP slot
        inv_t = jnp.transpose(inv, (0, 2, 1))             # (bt, N, 1)
        h_scaled = (h_b * inv_t).astype(jnp.bfloat16)     # (bt, N, D) bf16

        # --- h' = relu(attention @ h)
        h_prime = jnp.maximum(
            jnp.einsum('bnm,bmd->bnd', p_b, h_scaled,
                       preferred_element_type=jnp.float32), 0.0)          # (bt, N, D) f32

        # --- gate: Linear(2D -> 1) as VPU multiply + lane reduction (MXU stays free)
        gwx = gwx_ref[...].reshape(1, 1, D)               # f32
        gwh = gwh_ref[...].reshape(1, 1, D)               # f32
        gb = gb_ref[...].reshape(1, 1, 1)                 # f32
        logits = jnp.sum(x * gwx + h_prime * gwh, axis=-1, keepdims=True) + gb
        coeff = jax.nn.sigmoid(logits)                    # (bt, N, 1)

        out_ref[...] = (coeff * x + (1.0 - coeff) * h_prime).astype(out_ref.dtype)

    return kernel


def _round_up(v, m):
    return ((v + m - 1) // m) * m


def _pad_to(a, shape):
    pads = [(0, t - s) for s, t in zip(a.shape, shape)]
    if all(p == (0, 0) for p in pads):
        return a
    return jnp.pad(a, pads)


def _footprint_bytes(bt, Np, Dp, adj_itemsize):
    """Rough per-grid-step VMEM footprint (double-buffered I/O + weights + temps)."""
    io = 2 * (bt * Np * Dp * 4 + bt * Np * Np * adj_itemsize) + 2 * bt * Np * Dp * 4
    weights = 2 * (2 * Dp * Dp * 2 + 4 * Dp * 4 + 512)
    temps = (3 * bt * Np * Np * 4          # e / att / p (f32)
             + bt * Np * Np * 2            # p_b (bf16)
             + 6 * bt * Np * Dp * 4)       # h / hA / h_scaled / h_prime / gate temps
    return io + weights + temps


def _vmem_budget_bytes():
    """Generation-aware VMEM budget (v5e/v6e: 128 MiB, v7x: 64 MiB) with headroom
    for Mosaic-inserted temporaries (cast / reshape copies)."""
    cap = 64 * 1024 * 1024                 # v7x-safe fallback
    try:
        info = pltpu.get_tpu_info()
        cap = int(getattr(info, "vmem_capacity_bytes", cap)) or cap
    except Exception:
        pass
    return int(cap * 0.80)


def _pick_batch_tile(B, Np, Dp, adj_itemsize, budget, target_rows=256):
    """Largest divisor of B that (a) leaves >= 2 grid steps (both v7x TCs busy),
    (b) fits the VMEM budget, (c) does not overshoot ~target_rows MXU rows."""
    max_bt = max(1, B // 2)
    bt = 1
    for d in range(1, max_bt + 1):
        if B % d:
            continue
        if _footprint_bytes(d, Np, Dp, adj_itemsize) > budget:
            break
        bt = d
        if d * Np >= target_rows:
            break
    return bt


def gat_gate(x, adj, W_weight, W_bias, A, gate_weight, gate_bias,
             *, batch_tile=None, adj_is_binary=True):
    """GAT_gate.forward.

    x:           (B, N, D) float32
    adj:         (B, N, N) adjacency (0/1 by default; set adj_is_binary=False for
                 weighted edges, shipped in bf16)
    W_weight:    (D, D)   torch nn.Linear(D, D).weight   (out_features, in_features)
    W_bias:      (D,)     torch nn.Linear(D, D).bias
    A:           (D, D)   torch Parameter
    gate_weight: (1, 2D)  torch nn.Linear(2D, 1).weight
    gate_bias:   (1,)     torch nn.Linear(2D, 1).bias
    """
    B, N, D = x.shape
    assert adj.shape == (B, N, N)

    # Pad D to full 128-lane vregs (dense MXU lanes, unmasked output stores) and N
    # to the 8-sublane multiple (copy-free in-kernel reshapes).  Padded nodes get
    # adj == 0 -> fully masked; padded rows/cols are sliced off below.
    Dp = _round_up(D, 128)
    Np = _round_up(N, 8)
    # TODO(synk): for very large graphs, tile N with a two-pass column softmax and
    #             pad the attention lane dim to 128 instead of holding full (N,N).

    x_p = _pad_to(x.astype(jnp.float32), (B, Np, Dp))
    if adj_is_binary:
        adj_p = _pad_to((adj > 0).astype(jnp.int8), (B, Np, Np))   # 1 byte/edge in HBM
        adj_itemsize = 1
    else:
        adj_p = _pad_to(adj.astype(jnp.bfloat16), (B, Np, Np))     # weighted edges
        adj_itemsize = 2

    # Parameter prep (done once in the wrapper, outside the kernel):
    Wt = _pad_to(W_weight.T, (Dp, Dp)).astype(jnp.bfloat16)        # x @ Wt == x @ W.T
    bw = _pad_to(W_bias.reshape(1, D), (1, Dp)).astype(jnp.float32)
    A_sym = _pad_to(A + A.T, (Dp, Dp)).astype(jnp.bfloat16)        # folds e + e^T
    gwx = _pad_to(gate_weight[:, :D], (1, Dp)).astype(jnp.float32)
    gwh = _pad_to(gate_weight[:, D:], (1, Dp)).astype(jnp.float32)
    gb = gate_bias.reshape(1, 1).astype(jnp.float32)

    budget = _vmem_budget_bytes()
    bt = (_pick_batch_tile(B, Np, Dp, adj_itemsize, budget)
          if batch_tile is None else batch_tile)
    assert B % bt == 0, f"batch_tile {bt} must divide B={B}"

    vmem_limit = int(min(max(2 * _footprint_bytes(bt, Np, Dp, adj_itemsize),
                             32 * 1024 * 1024), budget))

    kernel = _make_gat_gate_kernel(adj_is_binary)

    out = pl.pallas_call(
        kernel,
        out_shape=jax.ShapeDtypeStruct((B, Np, Dp), jnp.float32),
        grid_spec=pltpu.PrefetchScalarGridSpec(
            num_scalar_prefetch=0,
            grid=(B // bt,),
            in_specs=[
                pl.BlockSpec((bt, Np, Dp), lambda b: (b, 0, 0)),   # x   (f32)
                pl.BlockSpec((bt, Np, Np), lambda b: (b, 0, 0)),   # adj (int8 / bf16)
                pl.BlockSpec((Dp, Dp), lambda b: (0, 0)),          # W^T (bf16)
                pl.BlockSpec((1, Dp), lambda b: (0, 0)),           # W bias (f32)
                pl.BlockSpec((Dp, Dp), lambda b: (0, 0)),          # A + A^T (bf16)
                pl.BlockSpec((1, Dp), lambda b: (0, 0)),           # gate weight, x half
                pl.BlockSpec((1, Dp), lambda b: (0, 0)),           # gate weight, h' half
                pl.BlockSpec((1, 1), lambda b: (0, 0)),            # gate bias
            ],
            out_specs=pl.BlockSpec((bt, Np, Dp), lambda b: (b, 0, 0)),
        ),
        compiler_params=pltpu.CompilerParams(
            dimension_semantics=("parallel",),
            vmem_limit_bytes=vmem_limit),
    )(x_p, adj_p, Wt, bw, A_sym, gwx, gwh, gb)

    return out[:, :N, :D]


if __name__ == "__main__":
    key = jax.random.PRNGKey(0)
    B, N, D = 2, 8, 32
    ks = jax.random.split(key, 7)

    x = jax.random.normal(ks[0], (B, N, D), jnp.float32)
    adj = jax.random.bernoulli(ks[1], 0.5, (B, N, N)).astype(jnp.float32)
    adj = jnp.maximum(adj, jnp.eye(N, dtype=jnp.float32)[None])   # self-loops

    # Deterministic synthetic parameters in torch layout. (PyTorch inits A to zeros;
    # small randoms are used here to actually exercise the attention path.)
    W_weight = jax.random.normal(ks[2], (D, D), jnp.float32) * 0.1
    W_bias = jax.random.normal(ks[3], (D,), jnp.float32) * 0.1
    A = jax.random.normal(ks[4], (D, D), jnp.float32) * 0.1
    gate_weight = jax.random.normal(ks[5], (1, 2 * D), jnp.float32) * 0.1
    gate_bias = jax.random.normal(ks[6], (1,), jnp.float32) * 0.1

    out = jax.block_until_ready(
        gat_gate(x, adj, W_weight, W_bias, A, gate_weight, gate_bias))

    # Reference 1: exact f32 mirror of the PyTorch forward (loose tol: the kernel
    # intentionally uses bf16 MXU operands and an approx reciprocal).
    def ref_f32(x, adj):
        h = x @ W_weight.T + W_bias
        e = jnp.einsum('bjl,bkl->bjk', jnp.einsum('bnd,de->bne', h, A), h)
        e = e + jnp.transpose(e, (0, 2, 1))
        att = jnp.where(adj > 0, e, jnp.full_like(e, -9.0e15))
        att = jax.nn.softmax(att, axis=1)
        att = att * adj
        hp = jax.nn.relu(jnp.einsum('bij,bjd->bid', att, h))
        coeff = jax.nn.sigmoid(
            jnp.concatenate([x, hp], axis=-1) @ gate_weight.T + gate_bias)
        return coeff * x + (1.0 - coeff) * hp

    # Reference 2: same math with the kernel's bf16-operand / f32-accumulation and
    # folded-normalisation structure (tight structural check; exact reciprocal).
    def ref_bf16(x, adj):
        bf = jnp.bfloat16
        mask = adj > 0
        Wt = W_weight.T.astype(bf)
        A_sym = (A + A.T).astype(bf)
        h = jnp.einsum('bnd,de->bne', x.astype(bf), Wt,
                       preferred_element_type=jnp.float32) + W_bias
        hb = h.astype(bf)
        hA = jnp.einsum('bnd,de->bne', hb, A_sym,
                        preferred_element_type=jnp.float32).astype(bf)
        e = jnp.einsum('bnd,bmd->bnm', hA, hb, preferred_element_type=jnp.float32)
        att = jnp.where(mask, e, -9.0e15)
        m = jnp.max(att, axis=1, keepdims=True)
        p = jnp.exp(att - m)
        denom = jnp.sum(p, axis=1, keepdims=True)
        p_b = jnp.where(mask, p, 0.0).astype(bf)
        inv_t = jnp.transpose(1.0 / denom, (0, 2, 1))
        h_scaled = (hb * inv_t).astype(bf)
        hp = jax.nn.relu(jnp.einsum('bnm,bmd->bnd', p_b, h_scaled,
                                    preferred_element_type=jnp.float32))
        gwx = gate_weight[:, :D]
        gwh = gate_weight[:, D:]
        coeff = jax.nn.sigmoid(
            jnp.sum(x * gwx + hp * gwh, axis=-1, keepdims=True) + gate_bias)
        return coeff * x + (1.0 - coeff) * hp

    r32 = ref_f32(x, adj)
    rbf = ref_bf16(x, adj)
    assert out.shape == (B, N, D)
    err_bf = float(jnp.max(jnp.abs(out - rbf)))
    err_32 = float(jnp.max(jnp.abs(out - r32)))
    assert err_bf < 2e-2, f"bf16-mirrored reference mismatch: {err_bf}"
    assert err_32 < 1e-1, f"f32 reference mismatch: {err_32}"
    print("KERNEL_OK")
</pallas_src>

<mosaic_0001>
module attributes {stable_mosaic.version = 11 : i64} {
  func.func @kernel(%arg0: i32, %arg1: memref<1x8x128xf32, #tpu.memory_space<vmem>>, %arg2: memref<1x8x8xi8, #tpu.memory_space<vmem>>, %arg3: memref<128x128xbf16, #tpu.memory_space<vmem>>, %arg4: memref<1x128xf32, #tpu.memory_space<vmem>>, %arg5: memref<128x128xbf16, #tpu.memory_space<vmem>>, %arg6: memref<1x128xf32, #tpu.memory_space<vmem>>, %arg7: memref<1x128xf32, #tpu.memory_space<vmem>>, %arg8: memref<1x1xf32, #tpu.memory_space<vmem>>, %arg9: memref<1x8x128xf32, #tpu.memory_space<vmem>>) attributes {dimension_semantics = [#tpu.dimension_semantics<parallel>], iteration_bounds = array<i64: 2>, scalar_prefetch = 0 : i64, scratch_operands = 0 : i64, tpu.core_type = #tpu.core_type<tc>, window_params = [{transform_indices = @transform_0, window_bounds = array<i64: 1, 8, 128>}, {transform_indices = @transform_1, window_bounds = array<i64: 1, 8, 8>}, {pipeline_mode = #tpu.pipeline_mode<synchronous>, transform_indices = @transform_2, window_bounds = array<i64: 128, 128>}, {pipeline_mode = #tpu.pipeline_mode<synchronous>, transform_indices = @transform_3, window_bounds = array<i64: 1, 128>}, {pipeline_mode = #tpu.pipeline_mode<synchronous>, transform_indices = @transform_4, window_bounds = array<i64: 128, 128>}, {pipeline_mode = #tpu.pipeline_mode<synchronous>, transform_indices = @transform_5, window_bounds = array<i64: 1, 128>}, {pipeline_mode = #tpu.pipeline_mode<synchronous>, transform_indices = @transform_6, window_bounds = array<i64: 1, 128>}, {pipeline_mode = #tpu.pipeline_mode<synchronous>, transform_indices = @transform_7, window_bounds = array<i64: 1, 1>}, {transform_indices = @transform_8, window_bounds = array<i64: 1, 8, 128>}]} {
    %c0 = arith.constant 0 : index
    %c0_0 = arith.constant 0 : index
    %c0_1 = arith.constant 0 : index
    %0 = vector.load %arg1[%c0, %c0_0, %c0_1] : memref<1x8x128xf32, #tpu.memory_space<vmem>>, vector<1x8x128xf32>
    %c0_2 = arith.constant 0 : index
    %c0_3 = arith.constant 0 : index
    %c0_4 = arith.constant 0 : index
    %1 = vector.load %arg2[%c0_2, %c0_3, %c0_4] : memref<1x8x8xi8, #tpu.memory_space<vmem>>, vector<1x8x8xi8>
    %2 = arith.extsi %1 : vector<1x8x8xi8> to vector<1x8x8xi32>
    %c0_i32 = arith.constant 0 : i32
    %3 = vector.broadcast %c0_i32 : i32 to vector<1x8x8xi32>
    %4 = arith.cmpi sgt, %2, %3 : vector<1x8x8xi32>
    %c0_5 = arith.constant 0 : index
    %c0_6 = arith.constant 0 : index
    %5 = vector.load %arg3[%c0_5, %c0_6] : memref<128x128xbf16, #tpu.memory_space<vmem>>, vector<128x128xbf16>
    %c0_7 = arith.constant 0 : index
    %c0_8 = arith.constant 0 : index
    %6 = vector.load %arg5[%c0_7, %c0_8] : memref<128x128xbf16, #tpu.memory_space<vmem>>, vector<128x128xbf16>
    %c0_9 = arith.constant 0 : index
    %c0_10 = arith.constant 0 : index
    %7 = vector.load %arg4[%c0_9, %c0_10] : memref<1x128xf32, #tpu.memory_space<vmem>>, vector<1x128xf32>
    %8 = vector.shape_cast %0 : vector<1x8x128xf32> to vector<8x128xf32>
    %9 = arith.truncf %8 : vector<8x128xf32> to vector<8x128xbf16>
    %cst = arith.constant dense<0.000000e+00> : vector<8x128xf32>
    %10 = tpu.matmul %9, %5, %cst {dimension_numbers = #tpu.dot_dimension_numbers<[1], [0], [0], [1], [0, 0, 1, 1], [], []>} : vector<8x128xbf16>, vector<128x128xbf16>, vector<8x128xf32> -> vector<8x128xf32>
    %11 = vector.broadcast %7 : vector<1x128xf32> to vector<8x128xf32>
    %12 = arith.addf %10, %11 : vector<8x128xf32>
    %13 = arith.truncf %12 : vector<8x128xf32> to vector<8x128xbf16>
    %14 = vector.shape_cast %13 : vector<8x128xbf16> to vector<1x8x128xbf16>
    %cst_11 = arith.constant dense<0.000000e+00> : vector<8x128xf32>
    %15 = tpu.matmul %13, %6, %cst_11 {dimension_numbers = #tpu.dot_dimension_numbers<[1], [0], [0], [1], [0, 0, 1, 1], [], []>} : vector<8x128xbf16>, vector<128x128xbf16>, vector<8x128xf32> -> vector<8x128xf32>
    %16 = arith.truncf %15 : vector<8x128xf32> to vector<8x128xbf16>
    %17 = vector.shape_cast %16 : vector<8x128xbf16> to vector<1x8x128xbf16>
    "tpu.trace_start"() <{level = 10 : i32, message = "bnd,bmd->bnm"}> : () -> ()
    %cst_12 = arith.constant dense<0.000000e+00> : vector<1x8x8xf32>
    %18 = tpu.matmul %17, %14, %cst_12 {dimension_numbers = #tpu.dot_dimension_numbers<[2], [2], [1], [1], [0, 0, 0, 1, 1, 1], [0], [0]>} : vector<1x8x128xbf16>, vector<1x8x128xbf16>, vector<1x8x8xf32> -> vector<1x8x8xf32>
    %cst_13 = arith.constant -9.000000e+15 : f32
    "tpu.trace_stop"() : () -> ()
    %19 = vector.broadcast %cst_13 : f32 to vector<1x8x8xf32>
    %20 = arith.select %4, %18, %19 : vector<1x8x8xi1>, vector<1x8x8xf32>
    %cst_14 = arith.constant dense<0xFF800000> : vector<1x8xf32>
    %21 = vector.multi_reduction <maximumf>, %20, %cst_14 [1] : vector<1x8x8xf32> to vector<1x8xf32>
    %22 = vector.shape_cast %21 : vector<1x8xf32> to vector<1x1x8xf32>
    %23 = vector.broadcast %22 : vector<1x1x8xf32> to vector<1x8x8xf32>
    %24 = arith.subf %20, %23 : vector<1x8x8xf32>
    %25 = math.exp %24 : vector<1x8x8xf32>
    %cst_15 = arith.constant dense<0.000000e+00> : vector<1x8xf32>
    %26 = vector.multi_reduction <add>, %25, %cst_15 [1] : vector<1x8x8xf32> to vector<1x8xf32>
    %27 = vector.shape_cast %26 : vector<1x8xf32> to vector<1x1x8xf32>
    %cst_16 = arith.constant 0.000000e+00 : f32
    %28 = vector.broadcast %cst_16 : f32 to vector<1x8x8xf32>
    %29 = arith.select %4, %25, %28 : vector<1x8x8xi1>, vector<1x8x8xf32>
    %30 = arith.truncf %29 : vector<1x8x8xf32> to vector<1x8x8xbf16>
    %31 = tpu.reciprocal %27 {approx = true} : vector<1x1x8xf32> -> vector<1x1x8xf32>
    %32 = tpu.transpose %31, [0, 2, 1] : vector<1x1x8xf32> -> vector<1x8x1xf32>
    %33 = arith.extf %14 : vector<1x8x128xbf16> to vector<1x8x128xf32>
    %34 = vector.broadcast %32 : vector<1x8x1xf32> to vector<1x8x128xf32>
    %35 = arith.mulf %33, %34 : vector<1x8x128xf32>
    %36 = arith.truncf %35 : vector<1x8x128xf32> to vector<1x8x128xbf16>
    "tpu.trace_start"() <{level = 10 : i32, message = "bnm,bmd->bnd"}> : () -> ()
    %cst_17 = arith.constant dense<0.000000e+00> : vector<1x8x128xf32>
    %37 = tpu.matmul %30, %36, %cst_17 {dimension_numbers = #tpu.dot_dimension_numbers<[2], [1], [1], [2], [0, 0, 0, 1, 1, 2], [0], [0]>} : vector<1x8x8xbf16>, vector<1x8x128xbf16>, vector<1x8x128xf32> -> vector<1x8x128xf32>
    "tpu.trace_stop"() : () -> ()
    %cst_18 = arith.constant 0.000000e+00 : f32
    %38 = vector.broadcast %cst_18 : f32 to vector<1x8x128xf32>
    %39 = arith.maximumf %37, %38 : vector<1x8x128xf32>
    %c0_19 = arith.constant 0 : index
    %c0_20 = arith.constant 0 : index
    %40 = vector.load %arg6[%c0_19, %c0_20] : memref<1x128xf32, #tpu.memory_space<vmem>>, vector<1x128xf32>
    %41 = vector.shape_cast %40 : vector<1x128xf32> to vector<1x1x128xf32>
    %c0_21 = arith.constant 0 : index
    %c0_22 = arith.constant 0 : index
    %42 = vector.load %arg7[%c0_21, %c0_22] : memref<1x128xf32, #tpu.memory_space<vmem>>, vector<1x128xf32>
    %43 = vector.shape_cast %42 : vector<1x128xf32> to vector<1x1x128xf32>
    %c0_23 = arith.constant 0 : index
    %c0_24 = arith.constant 0 : index
    %44 = vector.load %arg8[%c0_23, %c0_24] : memref<1x1xf32, #tpu.memory_space<vmem>>, vector<1x1xf32>
    %45 = vector.shape_cast %44 : vector<1x1xf32> to vector<1x1x1xf32>
    %46 = vector.broadcast %41 : vector<1x1x128xf32> to vector<1x8x128xf32>
    %47 = arith.mulf %0, %46 : vector<1x8x128xf32>
    %48 = vector.broadcast %43 : vector<1x1x128xf32> to vector<1x8x128xf32>
    %49 = arith.mulf %39, %48 : vector<1x8x128xf32>
    %50 = arith.addf %47, %49 : vector<1x8x128xf32>
    %cst_25 = arith.constant dense<0.000000e+00> : vector<1x8xf32>
    %51 = vector.multi_reduction <add>, %50, %cst_25 [2] : vector<1x8x128xf32> to vector<1x8xf32>
    %52 = vector.shape_cast %51 : vector<1x8xf32> to vector<1x8x1xf32>
    %53 = vector.broadcast %45 : vector<1x1x1xf32> to vector<1x8x1xf32>
    %54 = arith.addf %52, %53 : vector<1x8x1xf32>
    %55 = arith.negf %54 : vector<1x8x1xf32>
    %56 = math.exp %55 : vector<1x8x1xf32>
    %cst_26 = arith.constant 1.000000e+00 : f32
    %57 = vector.broadcast %cst_26 : f32 to vector<1x8x1xf32>
    %58 = arith.addf %57, %56 : vector<1x8x1xf32>
    %59 = arith.divf %57, %58 : vector<1x8x1xf32>
    %60 = vector.broadcast %59 : vector<1x8x1xf32> to vector<1x8x128xf32>
    %61 = arith.mulf %60, %0 : vector<1x8x128xf32>
    %cst_27 = arith.constant 1.000000e+00 : f32
    %62 = vector.broadcast %cst_27 : f32 to vector<1x8x1xf32>
    %63 = arith.subf %62, %59 : vector<1x8x1xf32>
    %64 = vector.broadcast %63 : vector<1x8x1xf32> to vector<1x8x128xf32>
    %65 = arith.mulf %64, %39 : vector<1x8x128xf32>
    %66 = arith.addf %61, %65 : vector<1x8x128xf32>
    %c0_28 = arith.constant 0 : index
    %c0_29 = arith.constant 0 : index
    %c0_30 = arith.constant 0 : index
    %67 = vector.load %arg9[%c0_28, %c0_29, %c0_30] : memref<1x8x128xf32, #tpu.memory_space<vmem>>, vector<1x8x128xf32>
    tpu.vector_store %arg9[%c0_28, %c0_29, %c0_30], %66 {strides = array<i32>} : memref<1x8x128xf32, #tpu.memory_space<vmem>>, vector<1x8x128xf32>,
    return
  }
  func.func @transform_0(%arg0: i32) -> (i32, i32, i32) {
    %c0_i32 = arith.constant 0 : i32
    %c0_i32_0 = arith.constant 0 : i32
    %c0_i32_1 = arith.constant 0 : i32
    return %arg0, %c0_i32, %c0_i32_0 : i32, i32, i32
  }
  func.func @transform_1(%arg0: i32) -> (i32, i32, i32) {
    %c0_i32 = arith.constant 0 : i32
    %c0_i32_0 = arith.constant 0 : i32
    %c0_i32_1 = arith.constant 0 : i32
    return %arg0, %c0_i32, %c0_i32_0 : i32, i32, i32
  }
  func.func @transform_2(%arg0: i32) -> (i32, i32) {
    %c0_i32 = arith.constant 0 : i32
    %c0_i32_0 = arith.constant 0 : i32
    %c0_i32_1 = arith.constant 0 : i32
    return %c0_i32, %c0_i32_0 : i32, i32
  }
  func.func @transform_3(%arg0: i32) -> (i32, i32) {
    %c0_i32 = arith.constant 0 : i32
    %c0_i32_0 = arith.constant 0 : i32
    %c0_i32_1 = arith.constant 0 : i32
    return %c0_i32, %c0_i32_0 : i32, i32
  }
  func.func @transform_4(%arg0: i32) -> (i32, i32) {
    %c0_i32 = arith.constant 0 : i32
    %c0_i32_0 = arith.constant 0 : i32
    %c0_i32_1 = arith.constant 0 : i32
    return %c0_i32, %c0_i32_0 : i32, i32
  }
  func.func @transform_5(%arg0: i32) -> (i32, i32) {
    %c0_i32 = arith.constant 0 : i32
    %c0_i32_0 = arith.constant 0 : i32
    %c0_i32_1 = arith.constant 0 : i32
    return %c0_i32, %c0_i32_0 : i32, i32
  }
  func.func @transform_6(%arg0: i32) -> (i32, i32) {
    %c0_i32 = arith.constant 0 : i32
    %c0_i32_0 = arith.constant 0 : i32
    %c0_i32_1 = arith.constant 0 : i32
    return %c0_i32, %c0_i32_0 : i32, i32
  }
  func.func @transform_7(%arg0: i32) -> (i32, i32) {
    %c0_i32 = arith.constant 0 : i32
    %c0_i32_0 = arith.constant 0 : i32
    %c0_i32_1 = arith.constant 0 : i32
    return %c0_i32, %c0_i32_0 : i32, i32
  }
  func.func @transform_8(%arg0: i32) -> (i32, i32, i32) {
    %c0_i32 = arith.constant 0 : i32
    %c0_i32_0 = arith.constant 0 : i32
    %c0_i32_1 = arith.constant 0 : i32
    return %arg0, %c0_i32, %c0_i32_0 : i32, i32, i32
  }
}

</mosaic_0001>

<bundles_post_ra>
// kernel: tpu_custom_call.1
= control target key start
LH: loop header
LB: loop body
LE: loop exit
PB: predicated region body
PF: predicated region fallthrough
CT: control target
= control target key end

     0   :  { %s1681_s0 = inlined_call_operand.hbm [shape: f32[2,8,128], index: 0, kind: input, shape index: {}]   ;;  %s1682_s1 = inlined_call_operand.hbm [shape: s8[2,8,8], index: 1, kind: input, shape index: {}]   ;;  %s1683_s2 = inlined_call_operand.hbm [shape: bf16[128,128], index: 2, kind: input, shape index: {}]   ;;  %s1684_s3 = inlined_call_operand.vmem [shape: f32[1,128], index: 3, kind: input, shape index: {}]   ;;  %s1685_s4 = inlined_call_operand.hbm [shape: bf16[128,128], index: 4, kind: input, shape index: {}]   ;;  %s1686_s5 = inlined_call_operand.vmem [shape: f32[1,128], index: 5, kind: input, shape index: {}]   ;;  %s1687_s6 = inlined_call_operand.vmem [shape: f32[1,128], index: 6, kind: input, shape index: {}]   ;;  %s1688_s7 = inlined_call_operand.<no memory space> [shape: f32[1,1], index: 7, kind: input, shape index: {}]   ;;  %s1689_s8 = inlined_call_operand.hbm [shape: f32[2,8,128], index: 8, kind: output, shape index: {}]  }
   0x1   :  { %1694 = sst [smem:[#allocation17_spill]] %s1681_s0  ;;  %v13_v0 = vstv %s1688_s7 }
   0x2   :  { %1695 = sst [smem:[#allocation18_spill]] %s1683_s2  ;;  %14 = vst [vmem:[#allocation2] sm:$0x1] %v13_v0 }
   0x3   :  { %1696 = sst [smem:[#allocation19_spill]] %s1685_s4 }
   0x4   :  { %15 = vsyncpa [#allocation4], 0 }
   0x5   :  { %17 = vsyncpa [#allocation4 + $0x1], 0 }
   0x6   :  { %18 = vsyncpa [#allocation7], 0 }
   0x7   :  { %20 = vsyncpa [#allocation7 + $0x1], 0 }
   0x8   :  { %21 = vsyncpa [#allocation10], 0 }
   0x9   :  { %22 = vsyncpa [#allocation5], 0 }
   0xa   :  { %24 = vsyncpa [#allocation5 + $0x1], 0  ;;  %s1398_s29 = smov 0   ;;  %s1400_s30 = smov 0  }
   0xb   :  { %s1402_s9 = smov 0   ;;  %s1404_s10 = smov 0  }
   0xc LB: > { %s1419_s7 = sadd.s32 4294967295, %s1338_s10   ;;  %s936_s11 = sadd.s32 4294967294, %s1338_s10   ;;  %s1338_s10 = sphi %s1404_s10, %s1723_s10   ;;  %s1334_s9 = sphi %s1402_s9, %s1722_s9   ;;  %s1330_s30 = sphi %s1400_s30, %s1721_s30   ;;  %s1326_s29 = sphi %s1398_s29, %s1720_s29  }
   0xd   : > { %p50_p0 = scmp.ne.s32.totalorder %s1330_s30, %s1326_s29  ;;  %p1690_p1 = scmp.eq.s32.totalorder %s1419_s7, 0 }
   0xe   : > { %p232_p3 = scmp.eq.s32.totalorder %s936_s11, 1  ;;  %p937_p5 = scmp.ge.s32.totalorder %s1338_s10, 1 }
   0xf   : > { %p1428_p4 = por %p1690_p1, %p50_p0  ;;  %p239_p7 = scmp.lt.s32.totalorder %s1338_s10, 3 }
  0x10   : > { %p1433_p6 = por %p232_p3, %p50_p0  ;;  %s1340_s15 = smov [#allocation8]  }
  0x11   : > { %s1697_s12 = scalar_select %p1428_p4, 1, 0 }
  0x12   : > { %s1698_s13 = scalar_select %p1433_p6, 1, 0 }
  0x13   : > { %p1438_p8 = pnand %p937_p5, %p239_p7  ;;  %s251_s16 = sshll.u32 %s1340_s15, 4  ;;  %s252_s16 = int_to_ptr.vmem [resolvable:$true] %s251_s16 }
  0x14   : > { %s1341_s18 = smov [#allocation9]   ;;  %s1165_s20 = scalar_lea.vmem %s252_s16, 1024 }
  0x15   : > { %s1699_s14 = scalar_select %p1438_p8, 1, 0 }
  0x16   : > { %p1065_p9 = pneg %p1438_p8  ;;  %s267_s19 = sshll.u32 %s1341_s18, 4  ;;  %s268_s19 = int_to_ptr.vmem [resolvable:$true] %s267_s19 }
  0x17   : > { %p1166_p13 = scmp.ne.s32.totalorder %s252_s16, %s1165_s20  ;;  %p1173_p5 = scmp.lt.s32.totalorder %s252_s16, %s252_s16 }
  0x18   : > { %p1447_p11 = pnand %p1065_p9, %p1690_p1  ;;  %p1174_p7 = scmp.lt.s32.totalorder %s1165_s20, %s1165_s20 }
  0x1a   : > { %p1156_p12 = pneg %p1447_p11  ;;  %p1175_p10 = por %p1174_p7, %p1173_p5 }
  0x1c   : > { %p1168_p0 = pnand %p1166_p13, %p1156_p12 }
  0x1e   : > { %p1169_p3 = pneg %p1168_p0 }
  0x20   : > { %p1176_p9 = pnand %p1175_p10, %p1169_p3 }
  0x22   : > { %1179 = shalt.err (!%p1176_p9)
}
  0x23   : > { %s1342_s21 = smov 64   ;;  %s1343_s22 = smov 4  }
  0x24   : > { %s1701_s2 = sld [smem:[#allocation18_spill]]  ;;  %s1191_s25 = scalar_lea.vmem %s268_s19, 1024 }
  0x25   : > { %p1192_p1 = scmp.ne.s32.totalorder %s268_s19, %s1191_s25  ;;  %p1199_p2 = scmp.lt.s32.totalorder %s268_s19, %s268_s19 }
  0x26   : > { %p1200_p6 = scmp.lt.s32.totalorder %s1191_s25, %s1191_s25 }
  0x27   : > { %p1194_p13 = pnand %p1192_p1, %p1156_p12 }
  0x28   : > { %p1201_p5 = por %p1200_p6, %p1199_p2 }
  0x29   : > { %p1195_p0 = pneg %p1194_p13 }
  0x2a   : > { %1068 = dma.hbm_to_vmem [thread:$0]  (!%p1447_p11), %s1701_s2, 1024, %s252_s16, [#allocation7], %s1342_s21, %s1342_s21, %s1343_s22  }
  0x2b   : > { %p1202_p10 = pnand %p1201_p5, %p1195_p0 }
  0x2d   : > { %1205 = shalt.err (!%p1202_p10)
}
  0x2e   : > { %s1702_s4 = sld [smem:[#allocation19_spill]]  ;;  %s1470_s28 = sadd.s32 1, %s1338_s10  }
  0x2f   : > { %s37_s11 = sadd.s32 1, %s1334_s9  ;;  %s34_s15 = ssub.s32 %s1338_s10, %s1470_s28 }
  0x30   : > { %p44_p1 = scmp.ne.s32.totalorder %s1334_s9, %s1330_s30  ;;  %p35_p2 = scmp.eq.s32.totalorder %s34_s15, 0 }
  0x31   : > { %p45_p6 = scmp.eq.s32.totalorder %s1338_s10, 0  ;;  %p1703_p12 = scmp.eq.s32.totalorder %s1419_s7, 1 }
  0x32   : > { %p1085_p7 = scmp.lt.s32.totalorder %s1338_s10, 2  ;;  %s1489_s18 = sand.u32 1, %s1334_s9  }
  0x33   : > { %p1480_p3 = por %p1703_p12, %p44_p1  ;;  %p46_p9 = por %p45_p6, %p44_p1 }
  0x34   : > { %1071 = dma.hbm_to_vmem [thread:$0]  (!%p1447_p11), %s1702_s4, 1024, %s268_s19, [#allocation10], %s1342_s21, %s1342_s21, %s1343_s22  }
  0x35   : > { %s1704_s16 = scalar_select %p1480_p3, 1, 0 }
  0x36   : > { %s1486_s17 = scalar_select %p35_p2, %s1334_s9, %s37_s11  }
  0x37   : > { %s941_s19 = sshll.u32 %s1489_s18, 3  ;;  %s942_s20 = sshll.u32 %s1338_s10, 7 }
  0x38   : > { %s1705_s0 = sld [smem:[#allocation17_spill]]  ;;  %s294_s24 = scalar_lea.vmem [#allocation3], %s941_s19 }
  0x39   : > { %s301_s25 = sshll.u32 %s294_s24, 4  ;;  %p1500_p11 = pnand %p1085_p7, %p46_p9  ;;  %s1498_s25 = int_to_ptr.vmem [resolvable:$true] %s301_s25 }
  0x3a   : > { %s291_s15 = scalar_lea.sflag [#allocation4], %s1489_s18 }
  0x3b   : > { %p1208_p0 = pneg %p1500_p11 }
  0x3e   : > { %s1496_s23 = scalar_lea.hbm %s1705_s0, %s942_s20  ;;  %s1211_s21 = scalar_lea.hbm %s1705_s0, 256 }
  0x3f   : > { %s1206_s2 = scalar_lea.hbm %s1496_s23, 128  ;;  %p1212_p1 = scmp.lt.s32.totalorder %s1496_s23, %s1705_s0 }
  0x40   : > { %p1207_p13 = scmp.ne.s32.totalorder %s1496_s23, %s1206_s2  ;;  %p1213_p2 = scmp.lt.s32.totalorder %s1211_s21, %s1206_s2 }
  0x42   : > { %p1209_p5 = pnand %p1208_p0, %p1207_p13  ;;  %p1214_p6 = por %p1213_p2, %p1212_p1 }
  0x44   : > { %p1210_p10 = pneg %p1209_p5 }
  0x46   : > { %p1215_p12 = pnand %p1214_p6, %p1210_p10 }
  0x48   : > { %1218 = shalt.err (!%p1215_p12)
}
  0x49   : > { %s1219_s27 = scalar_lea.vmem %s1498_s25, 128  ;;  %s1344_s19 = smov [#allocation3]  }
  0x4a   : > { %p1220_p7 = scmp.ne.s32.totalorder %s1498_s25, %s1219_s27  ;;  %s1224_s20 = sshll.u32 %s1344_s19, 4  ;;  %s1225_s20 = int_to_ptr.vmem [resolvable:$false] %s1224_s20 }
  0x4b   : > { %s1226_s11 = scalar_lea.vmem %s1225_s20, 256  ;;  %p1227_p5 = scmp.lt.s32.totalorder %s1498_s25, %s1225_s20 }
  0x4c   : > { %p1222_p9 = pnand %p1220_p7, %p1208_p0  ;;  %p1228_p3 = scmp.lt.s32.totalorder %s1226_s11, %s1219_s27 }
  0x4e   : > { %p1223_p13 = pneg %p1222_p9  ;;  %p1229_p4 = por %p1228_p3, %p1227_p5 }
  0x50   : > { %p1230_p1 = pnand %p1229_p4, %p1223_p13 }
  0x52   : > { %1233 = shalt.err (!%p1230_p1)
}
  0x53   : > { %1075 = dma.hbm_to_vmem [thread:$0]  (!%p1500_p11), %s1496_s23, 128, %s1498_s25, %s291_s15  }
  0x54   : > { %s944_s2 = sshll.u32 %s1338_s10, 5  ;;  %s1707_s19 = sshll.u32 %s1489_s18, 1 }
  0x55   : > { %s1535_s24 = scalar_lea.hbm %s1682_s1, %s944_s2  ;;  %s312_s27 = scalar_lea.vmem [#allocation6], %s1707_s19 }
  0x56   : > { %s319_s11 = sshll.u32 %s312_s27, 4  ;;  %s1708_s20 = sand.u32 1, %s1338_s10   ;;  %s320_s11 = int_to_ptr.vmem [resolvable:$true] %s319_s11 }
  0x57   : > { %s309_s0 = scalar_lea.sflag [#allocation7], %s1708_s20  ;;  %s1234_s4 = scalar_lea.hbm %s1535_s24, 32 }
  0x58   : > { %p1235_p4 = scmp.ne.s32.totalorder %s1535_s24, %s1234_s4  ;;  %s1239_s15 = scalar_lea.hbm %s1682_s1, 64 }
  0x59   : > { %p1240_p2 = scmp.lt.s32.totalorder %s1535_s24, %s1682_s1  ;;  %p1241_p6 = scmp.lt.s32.totalorder %s1239_s15, %s1234_s4 }
  0x5a   : > { %p1237_p3 = pnand %p1235_p4, %p1208_p0 }
  0x5b   : > { %p1242_p12 = por %p1241_p6, %p1240_p2 }
  0x5c   : > { %p1238_p10 = pneg %p1237_p3 }
  0x5e   : > { %p1243_p7 = pnand %p1242_p12, %p1238_p10 }
  0x60   : > { %1246 = shalt.err (!%p1243_p7)
}
  0x61   : > { %s1247_s21 = scalar_lea.vmem %s320_s11, 32  ;;  %s1345_s22 = smov [#allocation6]  }
  0x62   : > { %p1248_p9 = scmp.ne.s32.totalorder %s320_s11, %s1247_s21  ;;  %s1252_s19 = sshll.u32 %s1345_s22, 4  ;;  %s1253_s19 = int_to_ptr.vmem [resolvable:$false] %s1252_s19 }
  0x63   : > { %s1254_s27 = scalar_lea.vmem %s1253_s19, 64  ;;  %p1255_p1 = scmp.lt.s32.totalorder %s320_s11, %s1253_s19 }
  0x64   : > { %p1250_p13 = pnand %p1248_p9, %p1208_p0  ;;  %p1256_p4 = scmp.lt.s32.totalorder %s1254_s27, %s1247_s21 }
  0x66   : > { %p1251_p5 = pneg %p1250_p13  ;;  %p1257_p3 = por %p1256_p4, %p1255_p1 }
  0x68   : > { %p1258_p8 = pnand %p1257_p3, %p1251_p5 }
  0x6a   : > { %1261 = shalt.err (!%p1258_p8)
}
  0x6b   : > { %1078 = dma.hbm_to_vmem [thread:$0]  (!%p1500_p11), %s1535_s24, 32, %s320_s11, %s309_s0  }
  0x6c   : > { %p1709_p10 = scmp.ne.s32.totalorder %s1699_s14, 0 }
  0x6d   : > { %s1562_s4 = sand.u32 (!%p1709_p10), 1, %s1330_s30   ;;  %p1710_p8 = scmp.ne.s32.totalorder (!%p1709_p10), %s1697_s12, 0 }
  0x6e   : > { %328 = sbr.rel (%p1709_p10) target bundleno = 1577 (0x629), region = 52  ;;  %s946_s20 = sshll.u32 (!%p1709_p10), %s1562_s4, 3 }
  0x6f   : > { %s331_s23 = scalar_lea.sflag (!%p1709_p10), [#allocation4], %s1562_s4  ;;  %s1568_s25 = scalar_lea.vmem (!%p1709_p10), [#allocation3], %s946_s20 }
  0x73   : > { %1305 = dma.done.wait (%p1710_p8), %s331_s23, 128  }
  0x74   : > { %1307 = vsyncadd (%p1710_p8), %s331_s23, 4294967168  ;;  %s339_s0 = sand.u32 1, %s1419_s7   ;;  %s947_s14 = sshll.u32 %s1562_s4, 1 }
  0x75   : > { %s340_s26 = scalar_lea.sflag [#allocation7], %s339_s0  ;;  %s1576_s24 = scalar_lea.vmem [#allocation6], %s947_s14 }
  0x76   : > { %1309 = dma.done.wait (%p1710_p8), %s340_s26, 32  }
  0x77   : > { %1311 = vsyncadd (%p1710_p8), %s340_s26, 4294967264  ;;  %p1711_p11 = scmp.eq.s32.totalorder %s1419_s7, 0 }
  0x79   : > { %1313 = dma.done.wait (%p1711_p11), [#allocation7], 1024   ;;  %p1712_p0 = pmov %p1711_p11 }
  0x7b   : > { %1315 = vsyncadd (%p1712_p0), [#allocation7], 4294966272  ;;  %p1713_p2 = pmov %p1712_p0 }
  0x7c   : > { %p1714_p6 = pmov %p1712_p0 }
  0x7d   : > { %1317 = dma.done.wait (%p1713_p2), [#allocation10], 1024  }
  0x7e   : > { %1319 = vsyncadd (%p1714_p6), [#allocation10], 4294966272  ;;  %v1346_v1 = vmov 0.0   ;;  %vm1347_vm0 = vmmov 0   ;;  %v1130_v2 = vld [vmem:[#allocation8 + $0x38] sm:$0xff]   ;;  %v1131_v3 = vld [vmem:[#allocation8 + $0x30] sm:$0xff]  }
  0x7f   : > { %999 = vmatprep.subr.bf16.mxu0 %v1346_v1  ;;  %1015 = vmatprep.mubr.msk.bf16.mxu0 %vm1347_vm0, %v1346_v1  ;;  %v1132_v4 = vld [vmem:[#allocation8 + $0x28] sm:$0xff]   ;;  %v1138_v5 = vld [vmem:[#allocation9 + $0x38] sm:$0xff]   ;;  %v1133_v6 = vld [vmem:[#allocation8 + $0x20] sm:$0xff]   ;;  %v1348_v32 = vmov 0   ;;  %vm653_vm2 = vcmask 64512   ;;  %vm717_vm3 = vcmask 1043456  }
  0x80   : > { %1019 = vmatprep.subr.bf16.mxu1 %v1346_v1  ;;  %1035 = vmatprep.mubr.msk.bf16.mxu1 %vm1347_vm0, %v1346_v1  ;;  %v1139_v7 = vld [vmem:[#allocation9 + $0x30] sm:$0xff]   ;;  %v1134_v8 = vld [vmem:[#allocation8 + $0x18] sm:$0xff]   ;;  %v1140_v9 = vld [vmem:[#allocation9 + $0x28] sm:$0xff]   ;;  %s974_s22 = sshll.u32 %s1419_s7, 7  ;;  %s388_s19 = scalar_lea.vmem [#allocation11], %s946_s20 }
  0x81   : > { %1000 = vmatpush3.bf16.msra.mxu0 %v1130_v2  ;;  %1020 = vmatpush3.bf16.msra.mxu1 %v1138_v5  ;;  %v1135_v10 = vld [vmem:[#allocation8 + $0x10] sm:$0xff]   ;;  %v1141_v11 = vld [vmem:[#allocation9 + $0x20] sm:$0xff]   ;;  %v1136_v12 = vld [vmem:[#allocation8 + $0x8] sm:$0xff]   ;;  %s824_s27 = sshll.u32 %s388_s19, 4  ;;  %s822_s0 = scalar_lea.hbm %s1689_s8, %s974_s22  ;;  %s825_s27 = int_to_ptr.vmem [resolvable:$true] %s824_s27 }
  0x82   : > { %1001 = vmatprep.subr.bf16.mxu0 %v1346_v1  ;;  %1021 = vmatprep.subr.bf16.mxu1 %v1346_v1  ;;  %v1142_v13 = vld [vmem:[#allocation9 + $0x18] sm:$0xff]   ;;  %v1137_v14 = vld [vmem:[#allocation8] sm:$0xff]   ;;  %v1143_v16 = vld [vmem:[#allocation9 + $0x10] sm:$0xff]   ;;  %s811_s14 = scalar_lea.sflag [#allocation5], %s1562_s4  ;;  %s1262_s26 = scalar_lea.vmem %s825_s27, 128 }
  0x83   : > { %v1607_v15 = vld [vmem:[%s1568_s25] sm:$0xff]  ;;  %v1145_v19 = vld [vmem:[#allocation9] sm:$0xff]   ;;  %v951_v20 = vld [vmem:[%s1684_s3] ss:$0 sm:$0xff]  ;;  %1129 = vset.pattern.permute.xlu1 %v1348_v32  ;;  %p1263_p12 = scmp.ne.s32.totalorder %s825_s27, %s1262_s26  ;;  %p1717_p7 = scmp.ne.s32.totalorder %s1704_s16, 0 }
  0x84   : > { %v427_v17 = vpack.c.bf16 %v1607_v15, %v1607_v15  ;;  %v1144_v18 = vld [vmem:[#allocation9 + $0x8] sm:$0xff]   ;;  %v391_v33 = vld [vmem:[%s1576_s24] sm:$0x3]  ;;  %s1349_s7 = smov [#allocation11]  }
  0x85   : > { %1002 = vmatpush3.bf16.msra.mxu0 %v1131_v3  ;;  %1022 = vmatpush3.bf16.msra.mxu1 %v1139_v7  ;;  %v392_v34 = vunpack.c.0.s8 %v391_v33  ;;  %v969_v3 = vld [vmem:[%s1686_s5] ss:$0 sm:$0xff]  ;;  %p1264_p9 = pnand %p1263_p12, %p1717_p7  ;;  %s1266_s24 = sshll.u32 %s1349_s7, 4  ;;  %s1267_s24 = int_to_ptr.vmem [resolvable:$false] %s1266_s24 }
  0x86   : > { %1003 = vmatprep.subr.bf16.mxu0 %v1346_v1  ;;  %1023 = vmatprep.subr.bf16.mxu1 %v1346_v1  ;;  %v970_v5 = vld [vmem:[%s1687_s6] ss:$0 sm:$0xff]  ;;  %v771_v7 = vmul.f32 %v969_v3, %v1607_v15  ;;  %s1268_s20 = scalar_lea.vmem %s1267_s24, 256  ;;  %p1269_p5 = scmp.lt.s32.totalorder %s825_s27, %s1267_s24 }
  0x87   : > { %vm1625_vm1 = vcmp.gt.s32.totalorder %v392_v34, 0  ;;  %p1265_p13 = pneg %p1264_p9  ;;  %p1270_p1 = scmp.lt.s32.totalorder %s1268_s20, %s1262_s26 }
  0x89   : > { %1004 = vmatpush3.bf16.msra.mxu0 %v1132_v4  ;;  %1024 = vmatpush3.bf16.msra.mxu1 %v1140_v9  ;;  %p1271_p4 = por %p1270_p1, %p1269_p5 }
  0x8a   : > { %1005 = vmatprep.subr.bf16.mxu0 %v1346_v1  ;;  %1025 = vmatprep.subr.bf16.mxu1 %v1346_v1 }
  0x8b   : > { %p1272_p3 = pnand %p1271_p4, %p1265_p13 }
  0x8d   : > { %1006 = vmatpush3.bf16.msra.mxu0 %v1133_v6  ;;  %1026 = vmatpush3.bf16.msra.mxu1 %v1141_v11 }
  0x8e   : > { %1007 = vmatprep.subr.bf16.mxu0 %v1346_v1  ;;  %1027 = vmatprep.subr.bf16.mxu1 %v1346_v1 }
  0x91   : > { %1008 = vmatpush3.bf16.msra.mxu0 %v1134_v8  ;;  %1028 = vmatpush3.bf16.msra.mxu1 %v1142_v13  ;;  %v971_v13 = vld [vmem:[#allocation2] ss:$0 sm:$0xff] }
  0x92   : > { %1009 = vmatprep.subr.bf16.mxu0 %v1346_v1  ;;  %1029 = vmatprep.subr.bf16.mxu1 %v1346_v1 }
  0x95   : > { %1010 = vmatpush3.bf16.msra.mxu0 %v1135_v10  ;;  %1030 = vmatpush3.bf16.msra.mxu1 %v1143_v16 }
  0x96   : > { %1011 = vmatprep.subr.bf16.mxu0 %v1346_v1  ;;  %1031 = vmatprep.subr.bf16.mxu1 %v1346_v1 }
  0x99   : > { %1012 = vmatpush3.bf16.msra.mxu0 %v1136_v12  ;;  %1032 = vmatpush3.bf16.msra.mxu1 %v1144_v18 }
  0x9a   : > { %1013 = vmatprep.subr.bf16.mxu0 %v1346_v1  ;;  %1033 = vmatprep.subr.bf16.mxu1 %v1346_v1 }
  0x9d   : > { %1014 = vmatpush3.bf16.msra.mxu0 %v1137_v14  ;;  %1034 = vmatpush3.bf16.msra.mxu1 %v1145_v19 }
  0x9e   : > { %1039 = vmatprep.subr.bf16.mxu0 %v1346_v1  ;;  %1045 = vmatprep.subr.bf16.mxu1 %v1346_v1 }
  0xa0   : > { %1016 = vmatmul.mubr.bf16.vlgmr.msra.gmra.mxu0 %v427_v17 }
  0xa1   : > { %1041 = vmatprep.mubr.msk.bf16.mxu0 %vm1347_vm0, %v1346_v1 }
 0x160   : > { %v516_v21 = vpop.f32.mrf.mxu0 }
 0x161   : > { %v517_v22 = vadd.f32 %v951_v20, %v516_v21 }
 0x162   : > { %v1017_v23 = vpop.f32.mrf.mxu0 }
 0x163   : > { %v522_v24 = vpack.c.bf16 %v517_v22, %v517_v22 }
 0x164   : > { %v519_v25 = vpop.f32.mrf.mxu0 }
 0x165   : > { %1036 = vmatmul.mubr.bf16.vlgmr.msra.gmra.mxu1 %v522_v24  ;;  %1040 = vmatpush3.bf16.xpose.msra.mxu0 %v522_v24  ;;  %v706_v61 = vunpack.c.l.bf16 %v522_v24 }
 0x166   : > { %v1018_v26 = vpop.f32.mrf.mxu0  ;;  %1047 = vmatprep.mubr.msk.bf16.mxu1 %vm1347_vm0, %v1346_v1 }
 0x225   : > { %v605_v27 = vpop.f32.mrf.mxu1 }
 0x226   : > { %v611_v28 = vpack.c.bf16 %v605_v27, %v605_v27 }
 0x227   : > { %v1037_v29 = vpop.f32.mrf.mxu1 }
 0x228   : > { %1042 = vmatmul.mubr.bf16.vlgmr.msra.gmra.mxu0 %v611_v28 }
 0x229   : > { %v608_v30 = vpop.f32.mrf.mxu1 }
 0x22b   : > { %v1038_v31 = vpop.f32.mrf.mxu1 }
 0x2e8   : > { %v646_v36 = vpop.f32.mrf.mxu0 }
 0x2e9   : > { %v652_v37 = vsel %vm1625_vm1, %v646_v36, -9e+15 }
 0x2ea   : > { %v654_v38 = vsel %vm653_vm2, %v652_v37, -inf  ;;  %v1043_v39 = vpop.f32.mrf.mxu0 }
 0x2eb   : > { %v655_v40 = vrot.slane %v654_v38, 4 }
 0x2ec   : > { %v649_v41 = vpop.f32.mrf.mxu0 }
 0x2ed   : > { %v656_v42 = vmax.f32 %v654_v38, %v655_v40 }
 0x2ee   : > { %v1044_v43 = vpop.f32.mrf.mxu0 }
 0x2ef   : > { %v657_v44 = vrot.slane %v656_v42, 2 }
 0x2f1   : > { %v658_v45 = vmax.f32 %v656_v42, %v657_v44 }
 0x2f3   : > { %v659_v46 = vrot.slane %v658_v45, 1 }
 0x2f5   : > { %v660_v47 = vmax.f32 %v658_v45, %v659_v46 }
 0x2f7   : > { %v661_v48 = vsub.f32 %v652_v37, %v660_v47 }
 0x2f9   : > { %v662_v49 = vmul.f32 1.442695, %v661_v48 }
 0x2fb   : > { %1146 = vpow2.f32 %v662_v49 }
 0x308   : > { %v1147_v50 = vpop.eup %1146 }
 0x309   : > { %v664_v51 = vsel %vm653_vm2, %v1147_v50, 0.0  ;;  %v671_v52 = vsel %vm1625_vm1, %v1147_v50, 0.0 }
 0x30a   : > { %v665_v53 = vrot.slane %v664_v51, 4  ;;  %v672_v2 = vpack.c.bf16 %v671_v52, %v671_v52 }
 0x30c   : > { %v666_v54 = vadd.f32 %v665_v53, %v664_v51 }
 0x30e   : > { %v667_v55 = vrot.slane %v666_v54, 2 }
 0x310   : > { %v668_v56 = vadd.f32 %v667_v55, %v666_v54 }
 0x312   : > { %v669_v57 = vrot.slane %v668_v56, 1 }
 0x314   : > { %v670_v58 = vadd.f32 %v669_v57, %v668_v56 }
 0x316   : > { %1148 = vrcp.f32 %v670_v58 }
 0x323   : > { %v1149_v59 = vpop.eup %1148 }
 0x324   : > { %674 = vxpose.xlu0.b32.start.end [1/1] (short) (narrow) %v1149_v59, 8 }
 0x34d   : > { %1128 = vset.pattern.permute.xlu0 %v1348_v32 }
 0x3a0   : > { %v690_v60 = vpop.trf.xlu0 }
 0x3a1   : > { %709 = vperm.xlu0 %1128, %v690_v60  }
 0x41c   : > { %v710_v62 = vpop.permute.xlu0 %709 }
 0x41d   : > { %v712_v63 = vmul.f32 %v710_v62, %v706_v61 }
 0x41f   : > { %v713_v0 = vpack.c.bf16 %v712_v63, %v712_v63 }
 0x421   : > { %v719_v1 = vsel %vm717_vm3, %v713_v0, 0 }
 0x422   : > { %1046 = vmatpush3.bf16.msra.mxu1 %v719_v1 }
 0x425   : > { %1048 = vmatmul.mubr.msk.bf16.vlgmr.msra.gmra.mxu1 %vm653_vm2, %v672_v2 }
 0x4e5   : > { %v755_v4 = vpop.f32.mrf.mxu1 }
 0x4e6   : > { %v761_v6 = vmax.f32 %v755_v4, 0.0 }
 0x4e7   : > { %v1049_v8 = vpop.f32.mrf.mxu1 }
 0x4e8   : > { %v778_v9 = vmul.f32 %v970_v5, %v761_v6 }
 0x4e9   : > { %v758_v10 = vpop.f32.mrf.mxu1 }
 0x4ea   : > { %v779_v11 = vadd.f32 %v778_v9, %v771_v7 }
 0x4eb   : > { %v1050_v12 = vpop.f32.mrf.mxu1 }
 0x4ec   : > { %780 = vadd.xlane.f32.xlu1 %v779_v11 }
 0x575   : > { %v781_v14 = vpop.xlane.xlu1 %780 }
 0x576   : > { %v788_v16 = vadd.f32 %v971_v13, %v781_v14 }
 0x578   : > { %v972_v17 = vmul.f32 -1.442695, %v788_v16 }
 0x57a   : > { %1150 = vpow2.f32 %v972_v17 }
 0x587   : > { %v1151_v18 = vpop.eup %1150 }
 0x588   : > { %v792_v19 = vadd.f32 1.0, %v1151_v18 }
 0x58a   : > { %1152 = vrcp.f32 %v792_v19 }
 0x597   : > { %v1153_v20 = vpop.eup %1152 }
 0x598   : > { %797 = vperm.xlu1 %1129, %v1153_v20   ;;  %v801_v21 = vsub.f32 1.0, %v1153_v20 }
 0x59c   : > { %804 = vperm.xlu1 %1129, %v801_v21  }
 0x613   : > { %v798_v22 = vpop.permute.xlu1 %797 }
 0x614   : > { %v800_v24 = vmul.f32 %v798_v22, %v1607_v15 }
 0x617   : > { %v805_v23 = vpop.permute.xlu1 %804 }
 0x618   : > { %v807_v25 = vmul.f32 %v805_v23, %v761_v6 }
 0x61a   : > { %v808_v26 = vadd.f32 %v807_v25, %v800_v24 }
 0x61c   : > { %809 = vst [vmem:[%s388_s19] sm:$0xff] %v808_v26 }
 0x61d   : > { %1275 = shalt.err (!%p1272_p3)
}
 0x61e   : > { %s1276_s12 = scalar_lea.hbm %s822_s0, 128  ;;  %s1280_s15 = scalar_lea.hbm %s1689_s8, 256 }
 0x61f   : > { %p1277_p10 = scmp.ne.s32.totalorder %s822_s0, %s1276_s12  ;;  %p1281_p0 = scmp.lt.s32.totalorder %s822_s0, %s1689_s8 }
 0x620   : > { %p1282_p2 = scmp.lt.s32.totalorder %s1280_s15, %s1276_s12 }
 0x621   : > { %p1278_p8 = pnand %p1277_p10, %p1717_p7 }
 0x622   : > { %p1283_p6 = por %p1282_p2, %p1281_p0 }
 0x623   : > { %p1279_p11 = pneg %p1278_p8 }
 0x625   : > { %p1284_p12 = pnand %p1283_p6, %p1279_p11 }
 0x627   : > { %1287 = shalt.err (!%p1284_p12)
}
 0x628   : > { %1063 = dma.vmem_to_hbm [thread:$0]  (%p1717_p7), %s825_s27, 128, %s822_s0, %s811_s14  }
 0x629 PF: > { %s836_s21 = sand.u32 1, %s1326_s29   ;;  %p1718_p9 = scmp.ne.s32.totalorder %s1698_s13, 0 }
 0x62a   : > { %p1719_p13 = scmp.ge.s32.totalorder %s1338_s10, 2  ;;  %s837_s22 = scalar_lea.sflag [#allocation5], %s836_s21 }
 0x62c   : > { %p1080_p5 = pnand %p1719_p13, %p1718_p9 }
 0x62e   : > { %p1081_p1 = pneg %p1080_p5 }
 0x630   : > { %1321 = dma.done.wait (%p1081_p1), %s837_s22, 128  }
 0x631   : > { %1323 = vsyncadd (%p1081_p1), %s837_s22, 4294967168  ;;  %p27_p4 = scmp.ge.s32.totalorder %s1470_s28, 4   ;;  %s1720_s29 = smov %s1330_s30 }
 0x632   : > { %s1721_s30 = smov %s1334_s9  ;;  %s1722_s9 = smov %s1486_s17 }
 0x633   : > { %s1723_s10 = smov %s1470_s28  ;;  %29 = sbr.rel (!%p27_p4) target bundleno = 12 (0xc), region = 118 }
 0x638   :  { %842 = vsyncpa [#allocation4], 1 }
 0x639   :  { %844 = vsyncpa [#allocation4 + $0x1], 1 }
 0x63a   :  { %845 = vsyncpa [#allocation7], 1 }
 0x63b   :  { %847 = vsyncpa [#allocation7 + $0x1], 1 }
 0x63c   :  { %848 = vsyncpa [#allocation10], 1 }
 0x63d   :  { %849 = vsyncpa [#allocation5], 1 }
 0x63e   :  { %851 = vsyncpa [#allocation5 + $0x1], 1 }

</bundles_post_ra>
